<compile_context>
chip_gen: v6e
topology: v6e:2x2x1
jax: 0.10.0
libtpu: 0.0.40
codegen_flags: <defaults>
</compile_context>

<pallas_src>
import functools

import jax
import jax.numpy as jnp
from jax.experimental import pallas as pl
from jax.experimental.pallas import tpu as pltpu


def _length_maxpool_kernel(x_ref, w_ref, b_ref, o_ref, *, seq_len, chunk_b):
    """One grid step: TB batch elements.

    x_ref : (TB*L, Din)     native x dtype (bf16 cast happens in VMEM below)
    w_ref : (Din, Dout_pad) bf16   (grid-invariant)
    b_ref : (1, Dout_pad)   f32    (grid-invariant)
    o_ref : (TB, Dout_pad)
    """
    tb, dout = o_ref.shape
    w = w_ref[...]
    b = b_ref[...]
    # Chunk over batch elements so the live f32 (CB*L, Dout_pad) matmul result
    # stays small even when TB is sized for multi-MiB DMA blocks.  Chunk
    # boundaries are static multiples of 8 -> aligned, zero-cost ref slices.
    for c in range(0, tb, chunk_b):
        cb = min(chunk_b, tb - c)
        xs = x_ref[pl.ds(c * seq_len, cb * seq_len), :].astype(jnp.bfloat16)
        y = jnp.dot(xs, w, preferred_element_type=jnp.float32)     # MXU, f32 acc
        m = jnp.max(y.reshape(cb, seq_len, dout), axis=1)          # max over L
        # bias + relu hoisted past the length-max (exact: monotone, L-invariant)
        o_ref[pl.ds(c, cb), :] = jnp.maximum(m + b, 0.0).astype(o_ref.dtype)


def _choose_tiles(B, L, Din, dout_pad, x_itemsize,
                  x_block_budget=8 << 20, chunk_budget=2 << 20,
                  step_budget=20 << 20):
    """Pick (TB, CB): batch elements per grid step / per in-kernel matmul chunk.

    TB targets multi-MiB x blocks (amortizes ~0.35us/step against HBM BW on
    v5e/v6e/v7x) while keeping the double-buffered x+out blocks inside a
    conservative per-step VMEM budget; CB bounds the live f32 matmul result.
    """
    per_b_x = L * Din * x_itemsize
    per_b_y = L * dout_pad * 4
    per_b_out = dout_pad * 4

    tb = max(1, x_block_budget // per_b_x)
    tb = min(tb, max(1, step_budget // (2 * per_b_x + 2 * per_b_out)))

    cb = max(1, chunk_budget // per_b_y)
    cb = min(cb, tb, B)
    if cb < B:
        cb = max(8, (cb // 8) * 8)          # sublane-aligned chunk offsets
    cb = min(cb, B)

    if tb >= B:
        tb = B
        # v7x megacore: keep >= 2 grid steps so both TensorCores get work.
        if B >= 16:
            half = (((B + 1) // 2) + 7) // 8 * 8
            if half < B:
                tb = half
    else:
        tb = max(cb, (tb // cb) * cb)       # multiple of 8 when tb < B
        tb = min(tb, B)
    return tb, min(cb, tb)


def length_max_pool_1d(x, weight, bias, *, out_dtype=None):
    """x: (B, L, Din); weight: (Dout, Din) (PyTorch nn.Linear layout); bias: (Dout,)."""
    B, L, Din = x.shape
    Dout = weight.shape[0]
    out_dtype = x.dtype if out_dtype is None else out_dtype

    lanes = 128
    dout_pad = ((Dout + lanes - 1) // lanes) * lanes

    tb, cb = _choose_tiles(B, L, Din, dout_pad, x.dtype.itemsize)
    grid = (pl.cdiv(B, tb),)

    # x keeps its native dtype (no wrapper-side bf16 HBM copy, no batch pad);
    # the reshape is free (row-major contiguous) and gives an aligned 2-D block.
    x2 = x.reshape(B * L, Din)

    # Parameter prep (transpose + lane-pad + bf16 cast).  In real use,
    # precompute once per parameter set / keep under the caller's jit so XLA
    # constant-folds it; padded Dout columns are zero and sliced off below.
    w_k = jnp.zeros((Din, dout_pad), jnp.bfloat16).at[:, :Dout].set(
        weight.T.astype(jnp.bfloat16))
    b_k = jnp.zeros((1, dout_pad), jnp.float32).at[0, :Dout].set(
        bias.astype(jnp.float32))

    out_itemsize = jnp.dtype(out_dtype).itemsize
    x_block_bytes = tb * L * Din * x.dtype.itemsize
    out_block_bytes = tb * dout_pad * out_itemsize
    w_bytes = Din * dout_pad * 2
    b_bytes = dout_pad * 4
    chunk_bytes = cb * L * (Din * 2 + dout_pad * 4)   # bf16 x chunk + f32 result
    vmem_need = (2 * x_block_bytes + 2 * out_block_bytes
                 + 2 * (w_bytes + b_bytes) + chunk_bytes)
    vmem_limit = int(min(48 << 20, max(vmem_need + (4 << 20), 16 << 20)))

    cost = pl.CostEstimate(
        flops=2 * B * L * Din * dout_pad,
        transcendentals=0,
        bytes_accessed=(B * L * Din * x.dtype.itemsize + w_bytes + b_bytes
                        + B * dout_pad * out_itemsize),
    )

    def make_call(single_buffer_params):
        def param_spec(shape):
            if single_buffer_params:
                return pl.BlockSpec(shape, lambda i: (0, 0),
                                    pipeline_mode=pl.Buffered(1))
            return pl.BlockSpec(shape, lambda i: (0, 0))

        return pl.pallas_call(
            functools.partial(_length_maxpool_kernel, seq_len=L, chunk_b=cb),
            out_shape=jax.ShapeDtypeStruct((B, dout_pad), out_dtype),
            grid_spec=pltpu.PrefetchScalarGridSpec(
                num_scalar_prefetch=0,
                grid=grid,
                in_specs=[
                    pl.BlockSpec((tb * L, Din), lambda i: (i, 0)),
                    param_spec((Din, dout_pad)),   # constant index -> 1 buffer
                    param_spec((1, dout_pad)),
                ],
                out_specs=pl.BlockSpec((tb, dout_pad), lambda i: (i, 0)),
            ),
            compiler_params=pltpu.CompilerParams(
                dimension_semantics=("parallel",),
                vmem_limit_bytes=vmem_limit,
            ),
            cost_estimate=cost,
        )

    try:
        out = make_call(True)(x2, w_k, b_k)
    except Exception:
        # Fallback for jax versions where pipeline_mode=pl.Buffered(1) on a
        # pallas_call in_spec isn't supported: default (double-buffered) specs.
        out = make_call(False)(x2, w_k, b_k)

    return out[:, :Dout]


def length_max_pool_1d_ref(x, weight, bias):
    # Same op order as the PyTorch module (relu(linear(x)) then max over L),
    # with the matmul in bf16 operands / f32 accumulation to match the kernel.
    y = jnp.einsum(
        "bld,od->blo",
        x.astype(jnp.bfloat16),
        weight.astype(jnp.bfloat16),
        preferred_element_type=jnp.float32,
    ) + bias.astype(jnp.float32)
    y = jnp.maximum(y, 0.0)
    return jnp.max(y, axis=1)


if __name__ == "__main__":
    B, L, Din, Dout = 2, 8, 32, 32

    key = jax.random.PRNGKey(0)
    kx, kw, kb = jax.random.split(key, 3)

    x = jax.random.normal(kx, (B, L, Din), dtype=jnp.float32)
    # nn.Linear(in_dim, out_dim)-shaped params: W (Dout, Din), b (Dout,)
    bound = 1.0 / (Din ** 0.5)
    weight = jax.random.uniform(kw, (Dout, Din), minval=-bound, maxval=bound,
                                dtype=jnp.float32)
    bias = jax.random.uniform(kb, (Dout,), minval=-bound, maxval=bound,
                              dtype=jnp.float32)

    out = length_max_pool_1d(x, weight, bias)
    out = jax.block_until_ready(out)

    ref = length_max_pool_1d_ref(x, weight, bias)
    assert out.shape == (B, Dout)
    assert jnp.allclose(out, ref, atol=1e-4, rtol=1e-4), "mismatch vs reference"

    # TODO(synk): linear=False path (plain max over dim=1) and the other
    # activations (swish/softplus/sigmoid/leakyrelu) are trivial variants of
    # the same kernel body and are not instantiated here.
    print("KERNEL_OK")
</pallas_src>

<mosaic_0001>
module attributes {stable_mosaic.version = 11 : i64} {
  func.func @_length_maxpool_kernel(%arg0: i32, %arg1: memref<16x32xf32, #tpu.memory_space<vmem>>, %arg2: memref<32x128xbf16, #tpu.memory_space<vmem>>, %arg3: memref<1x128xf32, #tpu.memory_space<vmem>>, %arg4: memref<2x128xf32, #tpu.memory_space<vmem>>) attributes {dimension_semantics = [#tpu.dimension_semantics<parallel>], iteration_bounds = array<i64: 1>, scalar_prefetch = 0 : i64, scratch_operands = 0 : i64, tpu.core_type = #tpu.core_type<tc>, window_params = [{transform_indices = @transform_0, window_bounds = array<i64: 16, 32>}, {pipeline_mode = #tpu.pipeline_mode<synchronous>, transform_indices = @transform_1, window_bounds = array<i64: 32, 128>}, {pipeline_mode = #tpu.pipeline_mode<synchronous>, transform_indices = @transform_2, window_bounds = array<i64: 1, 128>}, {transform_indices = @transform_3, window_bounds = array<i64: 2, 128>}]} {
    %c0 = arith.constant 0 : index
    %c0_0 = arith.constant 0 : index
    %0 = vector.load %arg2[%c0, %c0_0] : memref<32x128xbf16, #tpu.memory_space<vmem>>, vector<32x128xbf16>
    %c0_1 = arith.constant 0 : index
    %c0_2 = arith.constant 0 : index
    %1 = vector.load %arg3[%c0_1, %c0_2] : memref<1x128xf32, #tpu.memory_space<vmem>>, vector<1x128xf32>
    %c0_3 = arith.constant 0 : index
    %c0_4 = arith.constant 0 : index
    %2 = vector.load %arg1[%c0_3, %c0_4] : memref<16x32xf32, #tpu.memory_space<vmem>>, vector<16x32xf32>
    %3 = arith.truncf %2 : vector<16x32xf32> to vector<16x32xbf16>
    %cst = arith.constant dense<0.000000e+00> : vector<16x128xf32>
    %4 = tpu.matmul %3, %0, %cst {dimension_numbers = #tpu.dot_dimension_numbers<[1], [0], [0], [1], [0, 0, 1, 1], [], []>} : vector<16x32xbf16>, vector<32x128xbf16>, vector<16x128xf32> -> vector<16x128xf32>
    %5 = vector.shape_cast %4 : vector<16x128xf32> to vector<2x8x128xf32>
    %cst_5 = arith.constant dense<0xFF800000> : vector<2x128xf32>
    %6 = vector.multi_reduction <maximumf>, %5, %cst_5 [1] : vector<2x8x128xf32> to vector<2x128xf32>
    %7 = vector.broadcast %1 : vector<1x128xf32> to vector<2x128xf32>
    %8 = arith.addf %6, %7 : vector<2x128xf32>
    %cst_6 = arith.constant 0.000000e+00 : f32
    %9 = vector.broadcast %cst_6 : f32 to vector<2x128xf32>
    %10 = arith.maximumf %8, %9 : vector<2x128xf32>
    %c0_7 = arith.constant 0 : index
    %c0_8 = arith.constant 0 : index
    %11 = vector.load %arg4[%c0_7, %c0_8] : memref<2x128xf32, #tpu.memory_space<vmem>>, vector<2x128xf32>
    tpu.vector_store %arg4[%c0_7, %c0_8], %10 {strides = array<i32>} : memref<2x128xf32, #tpu.memory_space<vmem>>, vector<2x128xf32>,
    return
  }
  func.func @transform_0(%arg0: i32) -> (i32, i32) {
    %c0_i32 = arith.constant 0 : i32
    %c0_i32_0 = arith.constant 0 : i32
    return %arg0, %c0_i32 : i32, i32
  }
  func.func @transform_1(%arg0: i32) -> (i32, i32) {
    %c0_i32 = arith.constant 0 : i32
    %c0_i32_0 = arith.constant 0 : i32
    %c0_i32_1 = arith.constant 0 : i32
    return %c0_i32, %c0_i32_0 : i32, i32
  }
  func.func @transform_2(%arg0: i32) -> (i32, i32) {
    %c0_i32 = arith.constant 0 : i32
    %c0_i32_0 = arith.constant 0 : i32
    %c0_i32_1 = arith.constant 0 : i32
    return %c0_i32, %c0_i32_0 : i32, i32
  }
  func.func @transform_3(%arg0: i32) -> (i32, i32) {
    %c0_i32 = arith.constant 0 : i32
    %c0_i32_0 = arith.constant 0 : i32
    return %arg0, %c0_i32 : i32, i32
  }
}

module attributes {stable_mosaic.version = 11 : i64} {
  func.func @_length_maxpool_kernel(%arg0: i32, %arg1: memref<16x32xf32, #tpu.memory_space<vmem>>, %arg2: memref<32x128xbf16, #tpu.memory_space<vmem>>, %arg3: memref<1x128xf32, #tpu.memory_space<vmem>>, %arg4: memref<2x128xf32, #tpu.memory_space<vmem>>) attributes {dimension_semantics = [#tpu.dimension_semantics<parallel>], iteration_bounds = array<i64: 1>, scalar_prefetch = 0 : i64, scratch_operands = 0 : i64, tpu.core_type = #tpu.core_type<tc>, window_params = [{transform_indices = @transform_0, window_bounds = array<i64: 16, 32>}, {pipeline_mode = #tpu.pipeline_mode<synchronous>, transform_indices = @transform_1, window_bounds = array<i64: 32, 128>}, {pipeline_mode = #tpu.pipeline_mode<synchronous>, transform_indices = @transform_2, window_bounds = array<i64: 1, 128>}, {transform_indices = @transform_3, window_bounds = array<i64: 2, 128>}]} {
    %c0 = arith.constant 0 : index
    %c0_0 = arith.constant 0 : index
    %0 = vector.load %arg2[%c0, %c0_0] : memref<32x128xbf16, #tpu.memory_space<vmem>>, vector<32x128xbf16>
    %c0_1 = arith.constant 0 : index
    %c0_2 = arith.constant 0 : index
    %1 = vector.load %arg3[%c0_1, %c0_2] : memref<1x128xf32, #tpu.memory_space<vmem>>, vector<1x128xf32>
    %c0_3 = arith.constant 0 : index
    %c0_4 = arith.constant 0 : index
    %2 = vector.load %arg1[%c0_3, %c0_4] : memref<16x32xf32, #tpu.memory_space<vmem>>, vector<16x32xf32>
    %3 = arith.truncf %2 : vector<16x32xf32> to vector<16x32xbf16>
    %cst = arith.constant dense<0.000000e+00> : vector<16x128xf32>
    %4 = tpu.matmul %3, %0, %cst {dimension_numbers = #tpu.dot_dimension_numbers<[1], [0], [0], [1], [0, 0, 1, 1], [], []>} : vector<16x32xbf16>, vector<32x128xbf16>, vector<16x128xf32> -> vector<16x128xf32>
    %5 = vector.shape_cast %4 : vector<16x128xf32> to vector<2x8x128xf32>
    %cst_5 = arith.constant dense<0xFF800000> : vector<2x128xf32>
    %6 = vector.multi_reduction <maximumf>, %5, %cst_5 [1] : vector<2x8x128xf32> to vector<2x128xf32>
    %7 = vector.broadcast %1 : vector<1x128xf32> to vector<2x128xf32>
    %8 = arith.addf %6, %7 : vector<2x128xf32>
    %cst_6 = arith.constant 0.000000e+00 : f32
    %9 = vector.broadcast %cst_6 : f32 to vector<2x128xf32>
    %10 = arith.maximumf %8, %9 : vector<2x128xf32>
    %c0_7 = arith.constant 0 : index
    %c0_8 = arith.constant 0 : index
    %11 = vector.load %arg4[%c0_7, %c0_8] : memref<2x128xf32, #tpu.memory_space<vmem>>, vector<2x128xf32>
    tpu.vector_store %arg4[%c0_7, %c0_8], %10 {strides = array<i32>} : memref<2x128xf32, #tpu.memory_space<vmem>>, vector<2x128xf32>,
    return
  }
  func.func @transform_0(%arg0: i32) -> (i32, i32) {
    %c0_i32 = arith.constant 0 : i32
    %c0_i32_0 = arith.constant 0 : i32
    return %arg0, %c0_i32 : i32, i32
  }
  func.func @transform_1(%arg0: i32) -> (i32, i32) {
    %c0_i32 = arith.constant 0 : i32
    %c0_i32_0 = arith.constant 0 : i32
    %c0_i32_1 = arith.constant 0 : i32
    return %c0_i32, %c0_i32_0 : i32, i32
  }
  func.func @transform_2(%arg0: i32) -> (i32, i32) {
    %c0_i32 = arith.constant 0 : i32
    %c0_i32_0 = arith.constant 0 : i32
    %c0_i32_1 = arith.constant 0 : i32
    return %c0_i32, %c0_i32_0 : i32, i32
  }
  func.func @transform_3(%arg0: i32) -> (i32, i32) {
    %c0_i32 = arith.constant 0 : i32
    %c0_i32_0 = arith.constant 0 : i32
    return %arg0, %c0_i32 : i32, i32
  }
}

</mosaic_0001>

<bundles_post_ra>
// kernel: tpu_custom_call.1
= control target key start
LH: loop header
LB: loop body
LE: loop exit
PB: predicated region body
PF: predicated region fallthrough
CT: control target
= control target key end

     0   :  { %8 = vsyncpa [#allocation3], 0  ;;  %s287_s0 = inlined_call_operand.hbm [shape: f32[16,32], index: 0, kind: input, shape index: {}]   ;;  %s288_s1 = inlined_call_operand.hbm [shape: bf16[32,128], index: 1, kind: input, shape index: {}]   ;;  %s289_s2 = inlined_call_operand.vmem [shape: f32[1,128], index: 2, kind: input, shape index: {}]   ;;  %s290_s3 = inlined_call_operand.hbm [shape: f32[2,128], index: 3, kind: output, shape index: {}]  }
   0x1   :  { %9 = vsyncpa [#allocation6], 0 }
   0x2   :  { %10 = vsyncpa [#allocation4], 0  ;;  %s246_s12 = smov [#allocation2]  }
   0x3   :  { %s16_s13 = sshll.u32 %s246_s12, 4  ;;  %s17_s13 = int_to_ptr.vmem [resolvable:$true] %s16_s13 }
   0x4   :  { %s188_s14 = scalar_lea.vmem %s17_s13, 256  ;;  %p193_p1 = scmp.lt.s32.totalorder %s17_s13, %s17_s13 }
   0x5   :  { %p189_p0 = scmp.ne.s32.totalorder %s17_s13, %s188_s14  ;;  %p194_p2 = scmp.lt.s32.totalorder %s188_s14, %s188_s14 }
   0x7   :  { %p195_p3 = por %p194_p2, %p193_p1 }
   0x9   :  { %p196_p4 = pnand %p195_p3, %p189_p0 }
   0xb   :  { %199 = shalt.err (!%p196_p4)
}
   0xc   :  { %s247_s15 = smov 128   ;;  %s248_s16 = smov 8  }
   0xd   :  { %22 = dma.hbm_to_vmem [thread:$0]  %s287_s0, 256, %s17_s13, [#allocation3], %s247_s15, %s247_s15, %s248_s16  }
   0xe   :  { %s249_s19 = smov [#allocation5]  }
   0xf   :  { %s28_s20 = sshll.u32 %s249_s19, 4  ;;  %s29_s20 = int_to_ptr.vmem [resolvable:$true] %s28_s20 }
  0x10   :  { %s208_s21 = scalar_lea.vmem %s29_s20, 256  ;;  %p213_p6 = scmp.lt.s32.totalorder %s29_s20, %s29_s20 }
  0x11   :  { %p209_p5 = scmp.ne.s32.totalorder %s29_s20, %s208_s21  ;;  %p214_p7 = scmp.lt.s32.totalorder %s208_s21, %s208_s21 }
  0x13   :  { %p215_p8 = por %p214_p7, %p213_p6 }
  0x15   :  { %p216_p9 = pnand %p215_p8, %p209_p5 }
  0x17   :  { %219 = shalt.err (!%p216_p9)
}
  0x18   :  { %s250_s22 = smov 64   ;;  %s251_s23 = smov 4  }
  0x19   :  { %34 = dma.hbm_to_vmem [thread:$0]  %s288_s1, 256, %s29_s20, [#allocation6], %s250_s22, %s250_s22, %s251_s23  }
  0x1a   :  { %240 = dma.done.wait [#allocation3], 256  }
  0x1b   :  { %241 = vsyncadd [#allocation3], 4294967040 }
  0x1c   :  { %242 = dma.done.wait [#allocation6], 256  }
  0x1d   :  { %243 = vsyncadd [#allocation6], 4294967040  ;;  %v252_v0 = vmov 0.0   ;;  %vm253_vm0 = vmmov 0   ;;  %v178_v1 = vld [vmem:[#allocation5 + $0x8] sm:$0xff]   ;;  %v179_v2 = vld [vmem:[#allocation5] sm:$0xff]  }
  0x1e   :  { %161 = vmatprep.subr.bf16.mxu0 %v252_v0  ;;  %165 = vmatprep.mubr.msk.bf16.mxu0 %vm253_vm0, %v252_v0  ;;  %v49_v3 = vld [vmem:[#allocation2] sm:$0xff]  ;;  %v50_v4 = vld [vmem:[#allocation2 + $0x8] sm:$0xff]  ;;  %vm64_vm1 = vcmask 261120   ;;  %s254_s26 = smov [#allocation7]   ;;  %vm134_vm2 = vcmask 1041409  }
  0x1f   :  { %162 = vmatpush3.bf16.msra.mxu0 %v178_v1  ;;  %v51_v5 = vpack.c.bf16 %v50_v4, %v49_v3  ;;  %v157_v21 = vld [vmem:[%s289_s2] ss:$0 sm:$0xff]  ;;  %s144_s27 = sshll.u32 %s254_s26, 4  ;;  %s145_s27 = int_to_ptr.vmem [resolvable:$true] %s144_s27 }
  0x20   :  { %163 = vmatprep.subr.bf16.mxu0 %v252_v0  ;;  %s220_s28 = scalar_lea.vmem %s145_s27, 32  ;;  %p225_p11 = scmp.lt.s32.totalorder %s145_s27, %s145_s27 }
  0x21   :  { %p221_p10 = scmp.ne.s32.totalorder %s145_s27, %s220_s28  ;;  %p226_p12 = scmp.lt.s32.totalorder %s220_s28, %s220_s28 }
  0x23   :  { %164 = vmatpush3.bf16.msra.mxu0 %v179_v2  ;;  %p227_p13 = por %p226_p12, %p225_p11 }
  0x25   :  { %p228_p0 = pnand %p227_p13, %p221_p10 }
  0x26   :  { %166 = vmatmul.mubr.msk.bf16.vlgmr.msra.gmra.mxu0 %vm64_vm1, %v51_v5 }
  0xe6   :  { %v102_v6 = vpop.f32.mrf.mxu0 }
  0xe7   :  { %v109_v7 = vrot.slane %v102_v6, 4 }
  0xe8   :  { %v167_v8 = vpop.f32.mrf.mxu0 }
  0xe9   :  { %v110_v9 = vmax.f32 %v102_v6, %v109_v7 }
  0xea   :  { %v105_v10 = vpop.f32.mrf.mxu0 }
  0xeb   :  { %v111_v11 = vrot.slane %v110_v9, 2  ;;  %v115_v12 = vrot.slane %v105_v10, 4 }
  0xec   :  { %v168_v13 = vpop.f32.mrf.mxu0 }
  0xed   :  { %v112_v14 = vmax.f32 %v110_v9, %v111_v11  ;;  %v116_v15 = vmax.f32 %v105_v10, %v115_v12 }
  0xef   :  { %v113_v16 = vrot.slane %v112_v14, 1  ;;  %v117_v17 = vrot.slane %v116_v15, 2 }
  0xf1   :  { %v118_v18 = vmax.f32 %v116_v15, %v117_v17  ;;  %v114_v19 = vmax.f32 %v112_v14, %v113_v16 }
  0xf3   :  { %v119_v20 = vrot.slane %v118_v18, 1  ;;  %v127_v24 = vadd.f32 %v157_v21, %v114_v19 }
  0xf5   :  { %v120_v22 = vmax.f32 %v118_v18, %v119_v20  ;;  %v129_v26 = vmax.f32 %v127_v24, 0.0 }
  0xf7   :  { %v128_v23 = vadd.f32 %v157_v21, %v120_v22 }
  0xf9   :  { %v130_v25 = vmax.f32 %v128_v23, 0.0 }
  0xfb   :  { %v133_v27 = vrot.slane %v130_v25, 7 }
  0xfd   :  { %v135_v28 = vsel %vm134_vm2, %v133_v27, %v129_v26 }
  0xfe   :  { %137 = vst [vmem:[#allocation7] sm:$0x3] %v135_v28 }
  0xff   :  { %231 = shalt.err (!%p228_p0)
}
 0x100   :  { %147 = dma.vmem_to_hbm [thread:$0]  %s145_s27, 32, %s290_s3, [#allocation4]  }
 0x101   :  { %244 = dma.done.wait [#allocation4], 32  }
 0x102   :  { %245 = vsyncadd [#allocation4], 4294967264 }
 0x103   :  { %151 = vsyncpa [#allocation3], 1 }
 0x104   :  { %152 = vsyncpa [#allocation6], 1 }
 0x105   :  { %153 = vsyncpa [#allocation4], 1 }

// kernel: tpu_custom_call.1
= control target key start
LH: loop header
LB: loop body
LE: loop exit
PB: predicated region body
PF: predicated region fallthrough
CT: control target
= control target key end

     0   :  { %8 = vsyncpa [#allocation3], 0  ;;  %s287_s0 = inlined_call_operand.hbm [shape: f32[16,32], index: 0, kind: input, shape index: {}]   ;;  %s288_s1 = inlined_call_operand.hbm [shape: bf16[32,128], index: 1, kind: input, shape index: {}]   ;;  %s289_s2 = inlined_call_operand.vmem [shape: f32[1,128], index: 2, kind: input, shape index: {}]   ;;  %s290_s3 = inlined_call_operand.hbm [shape: f32[2,128], index: 3, kind: output, shape index: {}]  }
   0x1   :  { %9 = vsyncpa [#allocation6], 0 }
   0x2   :  { %10 = vsyncpa [#allocation4], 0  ;;  %s246_s12 = smov [#allocation2]  }
   0x3   :  { %s16_s13 = sshll.u32 %s246_s12, 4  ;;  %s17_s13 = int_to_ptr.vmem [resolvable:$true] %s16_s13 }
   0x4   :  { %s188_s14 = scalar_lea.vmem %s17_s13, 256  ;;  %p193_p1 = scmp.lt.s32.totalorder %s17_s13, %s17_s13 }
   0x5   :  { %p189_p0 = scmp.ne.s32.totalorder %s17_s13, %s188_s14  ;;  %p194_p2 = scmp.lt.s32.totalorder %s188_s14, %s188_s14 }
   0x7   :  { %p195_p3 = por %p194_p2, %p193_p1 }
   0x9   :  { %p196_p4 = pnand %p195_p3, %p189_p0 }
   0xb   :  { %199 = shalt.err (!%p196_p4)
}
   0xc   :  { %s247_s15 = smov 128   ;;  %s248_s16 = smov 8  }
   0xd   :  { %22 = dma.hbm_to_vmem [thread:$0]  %s287_s0, 256, %s17_s13, [#allocation3], %s247_s15, %s247_s15, %s248_s16  }
   0xe   :  { %s249_s19 = smov [#allocation5]  }
   0xf   :  { %s28_s20 = sshll.u32 %s249_s19, 4  ;;  %s29_s20 = int_to_ptr.vmem [resolvable:$true] %s28_s20 }
  0x10   :  { %s208_s21 = scalar_lea.vmem %s29_s20, 256  ;;  %p213_p6 = scmp.lt.s32.totalorder %s29_s20, %s29_s20 }
  0x11   :  { %p209_p5 = scmp.ne.s32.totalorder %s29_s20, %s208_s21  ;;  %p214_p7 = scmp.lt.s32.totalorder %s208_s21, %s208_s21 }
  0x13   :  { %p215_p8 = por %p214_p7, %p213_p6 }
  0x15   :  { %p216_p9 = pnand %p215_p8, %p209_p5 }
  0x17   :  { %219 = shalt.err (!%p216_p9)
}
  0x18   :  { %s250_s22 = smov 64   ;;  %s251_s23 = smov 4  }
  0x19   :  { %34 = dma.hbm_to_vmem [thread:$0]  %s288_s1, 256, %s29_s20, [#allocation6], %s250_s22, %s250_s22, %s251_s23  }
  0x1a   :  { %240 = dma.done.wait [#allocation3], 256  }
  0x1b   :  { %241 = vsyncadd [#allocation3], 4294967040 }
  0x1c   :  { %242 = dma.done.wait [#allocation6], 256  }
  0x1d   :  { %243 = vsyncadd [#allocation6], 4294967040  ;;  %v252_v0 = vmov 0.0   ;;  %vm253_vm0 = vmmov 0   ;;  %v178_v1 = vld [vmem:[#allocation5 + $0x8] sm:$0xff]   ;;  %v179_v2 = vld [vmem:[#allocation5] sm:$0xff]  }
  0x1e   :  { %161 = vmatprep.subr.bf16.mxu0 %v252_v0  ;;  %165 = vmatprep.mubr.msk.bf16.mxu0 %vm253_vm0, %v252_v0  ;;  %v49_v3 = vld [vmem:[#allocation2] sm:$0xff]  ;;  %v50_v4 = vld [vmem:[#allocation2 + $0x8] sm:$0xff]  ;;  %vm64_vm1 = vcmask 261120   ;;  %s254_s26 = smov [#allocation7]   ;;  %vm134_vm2 = vcmask 1041409  }
  0x1f   :  { %162 = vmatpush3.bf16.msra.mxu0 %v178_v1  ;;  %v51_v5 = vpack.c.bf16 %v50_v4, %v49_v3  ;;  %v157_v21 = vld [vmem:[%s289_s2] ss:$0 sm:$0xff]  ;;  %s144_s27 = sshll.u32 %s254_s26, 4  ;;  %s145_s27 = int_to_ptr.vmem [resolvable:$true] %s144_s27 }
  0x20   :  { %163 = vmatprep.subr.bf16.mxu0 %v252_v0  ;;  %s220_s28 = scalar_lea.vmem %s145_s27, 32  ;;  %p225_p11 = scmp.lt.s32.totalorder %s145_s27, %s145_s27 }
  0x21   :  { %p221_p10 = scmp.ne.s32.totalorder %s145_s27, %s220_s28  ;;  %p226_p12 = scmp.lt.s32.totalorder %s220_s28, %s220_s28 }
  0x23   :  { %164 = vmatpush3.bf16.msra.mxu0 %v179_v2  ;;  %p227_p13 = por %p226_p12, %p225_p11 }
  0x25   :  { %p228_p0 = pnand %p227_p13, %p221_p10 }
  0x26   :  { %166 = vmatmul.mubr.msk.bf16.vlgmr.msra.gmra.mxu0 %vm64_vm1, %v51_v5 }
  0xe6   :  { %v102_v6 = vpop.f32.mrf.mxu0 }
  0xe7   :  { %v109_v7 = vrot.slane %v102_v6, 4 }
  0xe8   :  { %v167_v8 = vpop.f32.mrf.mxu0 }
  0xe9   :  { %v110_v9 = vmax.f32 %v102_v6, %v109_v7 }
  0xea   :  { %v105_v10 = vpop.f32.mrf.mxu0 }
  0xeb   :  { %v111_v11 = vrot.slane %v110_v9, 2  ;;  %v115_v12 = vrot.slane %v105_v10, 4 }
  0xec   :  { %v168_v13 = vpop.f32.mrf.mxu0 }
  0xed   :  { %v112_v14 = vmax.f32 %v110_v9, %v111_v11  ;;  %v116_v15 = vmax.f32 %v105_v10, %v115_v12 }
  0xef   :  { %v113_v16 = vrot.slane %v112_v14, 1  ;;  %v117_v17 = vrot.slane %v116_v15, 2 }
  0xf1   :  { %v118_v18 = vmax.f32 %v116_v15, %v117_v17  ;;  %v114_v19 = vmax.f32 %v112_v14, %v113_v16 }
  0xf3   :  { %v119_v20 = vrot.slane %v118_v18, 1  ;;  %v127_v24 = vadd.f32 %v157_v21, %v114_v19 }
  0xf5   :  { %v120_v22 = vmax.f32 %v118_v18, %v119_v20  ;;  %v129_v26 = vmax.f32 %v127_v24, 0.0 }
  0xf7   :  { %v128_v23 = vadd.f32 %v157_v21, %v120_v22 }
  0xf9   :  { %v130_v25 = vmax.f32 %v128_v23, 0.0 }
  0xfb   :  { %v133_v27 = vrot.slane %v130_v25, 7 }
  0xfd   :  { %v135_v28 = vsel %vm134_vm2, %v133_v27, %v129_v26 }
  0xfe   :  { %137 = vst [vmem:[#allocation7] sm:$0x3] %v135_v28 }
  0xff   :  { %231 = shalt.err (!%p228_p0)
}
 0x100   :  { %147 = dma.vmem_to_hbm [thread:$0]  %s145_s27, 32, %s290_s3, [#allocation4]  }
 0x101   :  { %244 = dma.done.wait [#allocation4], 32  }
 0x102   :  { %245 = vsyncadd [#allocation4], 4294967264 }
 0x103   :  { %151 = vsyncpa [#allocation3], 1 }
 0x104   :  { %152 = vsyncpa [#allocation6], 1 }
 0x105   :  { %153 = vsyncpa [#allocation4], 1 }

</bundles_post_ra>
